<compile_context>
chip_gen: v5e
topology: v5e:2x2
jax: 0.10.0
libtpu: 0.0.40
codegen_flags: <defaults>
</compile_context>

<pallas_src>
import jax
import jax.numpy as jnp
from jax.experimental import pallas as pl
from jax.experimental.pallas import tpu as pltpu

EPS = 1e-5          # nn.BatchNorm2d default
NEG_SLOPE = 0.01    # nn.LeakyReLU default


def _round_up(x, m):
    return ((x + m - 1) // m) * m


def _conv_stats_kernel(x_ref, w_ref, y_ref, stats_ref):
    """3x3 'same' conv for one (image, row-tile) block as a single MXU matmul.

    x_ref    : (1, 1, TILE_H + 2, KROW)   bf16  row-flattened padded slab (halo incl.)
    w_ref    : (3 * KROW, W * COUT)       bf16  banded conv weight matrix
    y_ref    : (1, 1, TILE_H, W * COUT)   f32   conv output (lane-dense)
    stats_ref: (1, 1, 1, 2 * W * COUT)    f32   [per-lane sum | per-lane sum of squares]
    """
    tile_h = y_ref.shape[2]
    x = x_ref[0, 0]                                          # (TILE_H+2, KROW) bf16

    # "im2col" along rows only: three vertically shifted copies side by side.
    # KROW is a multiple of 128, so the lane concatenation is fully aligned.
    patch = jnp.concatenate([x[dy:dy + tile_h, :] for dy in range(3)], axis=1)

    # One bf16 x bf16 -> f32 MXU matmul replaces the nine K=CIN dots.
    y = jnp.dot(patch, w_ref[...], preferred_element_type=jnp.float32)
    y_ref[0, 0] = y                                          # unmasked lane-dense store

    # Partial BN statistics while the tile is live in registers (one pass);
    # the cheap (COUT,)-sized finish happens in the wrapper.
    s = jnp.sum(y, axis=0, keepdims=True)                    # (1, W*COUT)
    ss = jnp.sum(y * y, axis=0, keepdims=True)               # (1, W*COUT)
    stats_ref[0, 0] = jnp.concatenate([s, ss], axis=1)       # (1, 2*W*COUT)


def _bn_lrelu_kernel(y_ref, scale_ref, shift_ref, o_ref):
    """Fused BatchNorm affine + LeakyReLU on a lane-dense (TILE_H, W*COUT) tile.

    y_ref     : (1, 1, TILE_H, W * COUT) f32
    scale_ref : (1, W * COUT)            f32   gamma * rsqrt(var + eps), tiled over W
    shift_ref : (1, W * COUT)            f32   beta - mean * scale, tiled over W
    """
    y = y_ref[0, 0]
    z = y * scale_ref[...] + shift_ref[...]
    o_ref[0, 0] = jnp.where(z > 0, z, NEG_SLOPE * z)


@jax.jit
def building_block(x_nchw, w_oihw, gamma, beta):
    """Forward pass of BuildingBlock. x_nchw: (N, Cin, H, W) float32 -> (N, Cout, H, W)."""
    N, CIN, H, W = x_nchw.shape
    COUT = w_oihw.shape[0]

    tile_h = 8 if H % 8 == 0 else H          # row-tile height
    num_t = H // tile_h
    krow_raw = (W + 2) * CIN                 # flattened padded row width
    KROW = _round_up(krow_raw, 128)          # lane-align each row slab
    WCOUT = W * COUT                         # lane-dense output width

    # ---- layout plumbing (fused by XLA under this jit) ----------------------
    x_nhwc = jnp.transpose(x_nchw, (0, 2, 3, 1)).astype(jnp.float32)
    x_pad = jnp.pad(x_nhwc, ((0, 0), (1, 1), (1, 1), (0, 0)))          # spatial 'same' pad
    x_rows = x_pad.reshape(N, H + 2, krow_raw)
    x_rows = jnp.pad(x_rows, ((0, 0), (0, 0), (0, KROW - krow_raw)))   # lane pad (zeros)
    x_rows = x_rows.astype(jnp.bfloat16)
    # Overlapping row slabs (+1 halo row top/bottom) so every grid step is independent.
    slabs = jnp.stack(
        [x_rows[:, t * tile_h: t * tile_h + tile_h + 2, :] for t in range(num_t)],
        axis=1)                                                        # (N, num_t, tile_h+2, KROW)

    # Banded conv weight: out_row[h] = concat(row[h], row[h+1], row[h+2]) @ w_big
    # w_big[dy*KROW + w'*CIN + ci, w*COUT + co] = W[dy, w'-w, ci, co] for 0 <= w'-w <= 2.
    w_hwio = jnp.transpose(w_oihw, (2, 3, 1, 0)).astype(jnp.float32)   # (3, 3, CIN, COUT)
    sel = jnp.stack([jnp.eye(W + 2, W, k=-dx, dtype=jnp.float32) for dx in range(3)])
    wband = jnp.einsum("xpw,yxio->ypiwo", sel, w_hwio)                 # (3, W+2, CIN, W, COUT)
    w2 = wband.reshape(3, krow_raw, WCOUT)
    w2 = jnp.pad(w2, ((0, 0), (0, KROW - krow_raw), (0, 0)))
    w_big = w2.reshape(3 * KROW, WCOUT).astype(jnp.bfloat16)

    cparams = pltpu.CompilerParams(
        dimension_semantics=("parallel", "parallel"),   # shard grid across v7x TensorCores
        vmem_limit_bytes=32 * 1024 * 1024,              # fits v5e/v6e/v7x scoped VMEM
    )

    # ---- pass 1: conv (one bf16 matmul per tile) + partial BN stats ---------
    y_conv, stats = pl.pallas_call(
        _conv_stats_kernel,
        out_shape=(
            jax.ShapeDtypeStruct((N, num_t, tile_h, WCOUT), jnp.float32),
            jax.ShapeDtypeStruct((N, num_t, 1, 2 * WCOUT), jnp.float32),
        ),
        grid=(N, num_t),
        in_specs=[
            pl.BlockSpec((1, 1, tile_h + 2, KROW), lambda n, t: (n, t, 0, 0)),
            pl.BlockSpec((3 * KROW, WCOUT), lambda n, t: (0, 0)),
        ],
        out_specs=(
            pl.BlockSpec((1, 1, tile_h, WCOUT), lambda n, t: (n, t, 0, 0)),
            pl.BlockSpec((1, 1, 1, 2 * WCOUT), lambda n, t: (n, t, 0, 0)),
        ),
        compiler_params=cparams,
    )(slabs, w_big)

    # ---- global BN statistics (tiny (COUT,)-sized math, one-pass var, clamped) ----
    s_l = stats[:, :, 0, :WCOUT]
    ss_l = stats[:, :, 0, WCOUT:]
    ch_sum = s_l.sum(axis=(0, 1)).reshape(W, COUT).sum(axis=0)
    ch_sumsq = ss_l.sum(axis=(0, 1)).reshape(W, COUT).sum(axis=0)
    cnt = float(N * H * W)
    mean = ch_sum / cnt
    var = jnp.maximum(ch_sumsq / cnt - mean * mean, 0.0)   # guard E[x^2]-E[x]^2 cancellation
    inv_std = jax.lax.rsqrt(var + EPS)
    scale = gamma.astype(jnp.float32) * inv_std
    shift = beta.astype(jnp.float32) - mean * scale
    scale_l = jnp.tile(scale, (W,)).reshape(1, WCOUT)      # lane layout: w*COUT + c
    shift_l = jnp.tile(shift, (W,)).reshape(1, WCOUT)

    # ---- pass 2: fused BN affine + LeakyReLU on lane-dense tiles -------------
    out_ld = pl.pallas_call(
        _bn_lrelu_kernel,
        out_shape=jax.ShapeDtypeStruct((N, num_t, tile_h, WCOUT), jnp.float32),
        grid=(N, num_t),
        in_specs=[
            pl.BlockSpec((1, 1, tile_h, WCOUT), lambda n, t: (n, t, 0, 0)),
            pl.BlockSpec((1, WCOUT), lambda n, t: (0, 0)),
            pl.BlockSpec((1, WCOUT), lambda n, t: (0, 0)),
        ],
        out_specs=pl.BlockSpec((1, 1, tile_h, WCOUT), lambda n, t: (n, t, 0, 0)),
        compiler_params=cparams,
    )(y_conv, scale_l, shift_l)

    out_nhwc = out_ld.reshape(N, H, W, COUT)
    return jnp.transpose(out_nhwc, (0, 3, 1, 2))


def reference(x_nchw, w_oihw, gamma, beta):
    """Pure-JAX reference mirroring the PyTorch module (training-mode BN).

    The conv uses the same bf16-input / f32-accumulate MXU path as the kernel,
    so the comparison is tight; semantics otherwise match nn.Conv2d + BN + LeakyReLU.
    """
    x = jnp.transpose(x_nchw, (0, 2, 3, 1)).astype(jnp.bfloat16)
    w = jnp.transpose(w_oihw, (2, 3, 1, 0)).astype(jnp.bfloat16)
    y = jax.lax.conv_general_dilated(
        x, w, window_strides=(1, 1), padding="SAME",
        dimension_numbers=("NHWC", "HWIO", "NHWC"),
        preferred_element_type=jnp.float32)
    mean = jnp.mean(y, axis=(0, 1, 2))
    var = jnp.mean((y - mean) ** 2, axis=(0, 1, 2))
    yn = (y - mean) * jax.lax.rsqrt(var + EPS) * gamma + beta
    yn = jnp.where(yn > 0, yn, NEG_SLOPE * yn)
    return jnp.transpose(yn, (0, 3, 1, 2))


if __name__ == "__main__":
    key = jax.random.PRNGKey(0)
    k_x, k_w, k_g, k_b = jax.random.split(key, 4)

    N, CIN, H, W = 2, 4, 16, 16
    COUT = 32

    x = jax.random.normal(k_x, (N, CIN, H, W), jnp.float32)
    w = 0.1 * jax.random.normal(k_w, (COUT, CIN, 3, 3), jnp.float32)   # Conv2d weight OIHW
    gamma = 1.0 + 0.1 * jax.random.normal(k_g, (COUT,), jnp.float32)
    beta = 0.1 * jax.random.normal(k_b, (COUT,), jnp.float32)

    out = jax.block_until_ready(building_block(x, w, gamma, beta))
    ref = jax.block_until_ready(reference(x, w, gamma, beta))

    assert out.shape == (N, COUT, H, W)
    err = float(jnp.max(jnp.abs(out - ref)))
    assert err < 1e-3, f"max abs err = {err}"

    print("KERNEL_OK")
</pallas_src>

<mosaic_0001>
module attributes {stable_mosaic.version = 11 : i64} {
  func.func @_conv_stats_kernel(%arg0: i32, %arg1: i32, %arg2: memref<1x1x10x128xbf16, #tpu.memory_space<vmem>>, %arg3: memref<384x512xbf16, #tpu.memory_space<vmem>>, %arg4: memref<1x1x8x512xf32, #tpu.memory_space<vmem>>, %arg5: memref<1x1x1x1024xf32, #tpu.memory_space<vmem>>) attributes {dimension_semantics = [#tpu.dimension_semantics<parallel>, #tpu.dimension_semantics<parallel>], iteration_bounds = array<i64: 2, 2>, scalar_prefetch = 0 : i64, scratch_operands = 0 : i64, tpu.core_type = #tpu.core_type<tc>, window_params = [{transform_indices = @transform_0, window_bounds = array<i64: 1, 1, 10, 128>}, {pipeline_mode = #tpu.pipeline_mode<synchronous>, transform_indices = @transform_1, window_bounds = array<i64: 384, 512>}, {transform_indices = @transform_2, window_bounds = array<i64: 1, 1, 8, 512>}, {transform_indices = @transform_3, window_bounds = array<i64: 1, 1, 1, 1024>}]} {
    %c0 = arith.constant 0 : index
    %c0_0 = arith.constant 0 : index
    %c0_1 = arith.constant 0 : index
    %c0_2 = arith.constant 0 : index
    %0 = vector.load %arg2[%c0, %c0_0, %c0_1, %c0_2] : memref<1x1x10x128xbf16, #tpu.memory_space<vmem>>, vector<1x1x10x128xbf16>
    %1 = vector.shape_cast %0 : vector<1x1x10x128xbf16> to vector<10x128xbf16>
    %2 = vector.extract_strided_slice %1 {offsets = [0, 0], sizes = [8, 128], strides = [1, 1]} : vector<10x128xbf16> to vector<8x128xbf16>
    %3 = vector.extract_strided_slice %1 {offsets = [1, 0], sizes = [8, 128], strides = [1, 1]} : vector<10x128xbf16> to vector<8x128xbf16>
    %4 = vector.extract_strided_slice %1 {offsets = [2, 0], sizes = [8, 128], strides = [1, 1]} : vector<10x128xbf16> to vector<8x128xbf16>
    %5 = tpu.concatenate %2, %3, %4 in 1 : vector<8x128xbf16>, vector<8x128xbf16>, vector<8x128xbf16> -> vector<8x384xbf16>
    %c0_3 = arith.constant 0 : index
    %c0_4 = arith.constant 0 : index
    %6 = vector.load %arg3[%c0_3, %c0_4] : memref<384x512xbf16, #tpu.memory_space<vmem>>, vector<384x512xbf16>
    %cst = arith.constant dense<0.000000e+00> : vector<8x512xf32>
    %7 = tpu.matmul %5, %6, %cst {dimension_numbers = #tpu.dot_dimension_numbers<[1], [0], [0], [1], [0, 0, 1, 1], [], []>} : vector<8x384xbf16>, vector<384x512xbf16>, vector<8x512xf32> -> vector<8x512xf32>
    %c0_5 = arith.constant 0 : index
    %c0_6 = arith.constant 0 : index
    %c0_7 = arith.constant 0 : index
    %c0_8 = arith.constant 0 : index
    %8 = vector.load %arg4[%c0_5, %c0_6, %c0_7, %c0_8] : memref<1x1x8x512xf32, #tpu.memory_space<vmem>>, vector<1x1x8x512xf32>
    %9 = vector.shape_cast %8 : vector<1x1x8x512xf32> to vector<8x512xf32>
    %10 = vector.shape_cast %7 : vector<8x512xf32> to vector<1x1x8x512xf32>
    tpu.vector_store %arg4[%c0_5, %c0_6, %c0_7, %c0_8], %10 {strides = array<i32>} : memref<1x1x8x512xf32, #tpu.memory_space<vmem>>, vector<1x1x8x512xf32>,
    %cst_9 = arith.constant dense<0.000000e+00> : vector<512xf32>
    %11 = vector.multi_reduction <add>, %7, %cst_9 [0] : vector<8x512xf32> to vector<512xf32>
    %12 = vector.shape_cast %11 : vector<512xf32> to vector<1x512xf32>
    %13 = arith.mulf %7, %7 : vector<8x512xf32>
    %cst_10 = arith.constant dense<0.000000e+00> : vector<512xf32>
    %14 = vector.multi_reduction <add>, %13, %cst_10 [0] : vector<8x512xf32> to vector<512xf32>
    %15 = vector.shape_cast %14 : vector<512xf32> to vector<1x512xf32>
    %16 = tpu.concatenate %12, %15 in 1 : vector<1x512xf32>, vector<1x512xf32> -> vector<1x1024xf32>
    %c0_11 = arith.constant 0 : index
    %c0_12 = arith.constant 0 : index
    %c0_13 = arith.constant 0 : index
    %c0_14 = arith.constant 0 : index
    %17 = vector.load %arg5[%c0_11, %c0_12, %c0_13, %c0_14] : memref<1x1x1x1024xf32, #tpu.memory_space<vmem>>, vector<1x1x1x1024xf32>
    %18 = vector.shape_cast %17 : vector<1x1x1x1024xf32> to vector<1x1024xf32>
    %19 = vector.shape_cast %16 : vector<1x1024xf32> to vector<1x1x1x1024xf32>
    tpu.vector_store %arg5[%c0_11, %c0_12, %c0_13, %c0_14], %19 {strides = array<i32>} : memref<1x1x1x1024xf32, #tpu.memory_space<vmem>>, vector<1x1x1x1024xf32>,
    return
  }
  func.func @transform_0(%arg0: i32, %arg1: i32) -> (i32, i32, i32, i32) {
    %c0_i32 = arith.constant 0 : i32
    %c0_i32_0 = arith.constant 0 : i32
    %c0_i32_1 = arith.constant 0 : i32
    return %arg0, %arg1, %c0_i32, %c0_i32_0 : i32, i32, i32, i32
  }
  func.func @transform_1(%arg0: i32, %arg1: i32) -> (i32, i32) {
    %c0_i32 = arith.constant 0 : i32
    %c0_i32_0 = arith.constant 0 : i32
    %c0_i32_1 = arith.constant 0 : i32
    return %c0_i32, %c0_i32_0 : i32, i32
  }
  func.func @transform_2(%arg0: i32, %arg1: i32) -> (i32, i32, i32, i32) {
    %c0_i32 = arith.constant 0 : i32
    %c0_i32_0 = arith.constant 0 : i32
    %c0_i32_1 = arith.constant 0 : i32
    return %arg0, %arg1, %c0_i32, %c0_i32_0 : i32, i32, i32, i32
  }
  func.func @transform_3(%arg0: i32, %arg1: i32) -> (i32, i32, i32, i32) {
    %c0_i32 = arith.constant 0 : i32
    %c0_i32_0 = arith.constant 0 : i32
    %c0_i32_1 = arith.constant 0 : i32
    return %arg0, %arg1, %c0_i32, %c0_i32_0 : i32, i32, i32, i32
  }
}

module attributes {stable_mosaic.version = 11 : i64} {
  func.func @_bn_lrelu_kernel(%arg0: i32, %arg1: i32, %arg2: memref<1x1x8x512xf32, #tpu.memory_space<vmem>>, %arg3: memref<1x512xf32, #tpu.memory_space<vmem>>, %arg4: memref<1x512xf32, #tpu.memory_space<vmem>>, %arg5: memref<1x1x8x512xf32, #tpu.memory_space<vmem>>) attributes {dimension_semantics = [#tpu.dimension_semantics<parallel>, #tpu.dimension_semantics<parallel>], iteration_bounds = array<i64: 2, 2>, scalar_prefetch = 0 : i64, scratch_operands = 0 : i64, tpu.core_type = #tpu.core_type<tc>, window_params = [{transform_indices = @transform_0, window_bounds = array<i64: 1, 1, 8, 512>}, {pipeline_mode = #tpu.pipeline_mode<synchronous>, transform_indices = @transform_1, window_bounds = array<i64: 1, 512>}, {pipeline_mode = #tpu.pipeline_mode<synchronous>, transform_indices = @transform_2, window_bounds = array<i64: 1, 512>}, {transform_indices = @transform_3, window_bounds = array<i64: 1, 1, 8, 512>}]} {
    %c0 = arith.constant 0 : index
    %c0_0 = arith.constant 0 : index
    %c0_1 = arith.constant 0 : index
    %c0_2 = arith.constant 0 : index
    %0 = vector.load %arg2[%c0, %c0_0, %c0_1, %c0_2] : memref<1x1x8x512xf32, #tpu.memory_space<vmem>>, vector<1x1x8x512xf32>
    %1 = vector.shape_cast %0 : vector<1x1x8x512xf32> to vector<8x512xf32>
    %c0_3 = arith.constant 0 : index
    %c0_4 = arith.constant 0 : index
    %2 = vector.load %arg3[%c0_3, %c0_4] : memref<1x512xf32, #tpu.memory_space<vmem>>, vector<1x512xf32>
    %3 = vector.broadcast %2 : vector<1x512xf32> to vector<8x512xf32>
    %4 = arith.mulf %1, %3 : vector<8x512xf32>
    %c0_5 = arith.constant 0 : index
    %c0_6 = arith.constant 0 : index
    %5 = vector.load %arg4[%c0_5, %c0_6] : memref<1x512xf32, #tpu.memory_space<vmem>>, vector<1x512xf32>
    %6 = vector.broadcast %5 : vector<1x512xf32> to vector<8x512xf32>
    %7 = arith.addf %4, %6 : vector<8x512xf32>
    %cst = arith.constant 0.000000e+00 : f32
    %8 = vector.broadcast %cst : f32 to vector<8x512xf32>
    %9 = arith.cmpf ogt, %7, %8 : vector<8x512xf32>
    %cst_7 = arith.constant 0.00999999977 : f32
    %10 = vector.broadcast %cst_7 : f32 to vector<8x512xf32>
    %11 = arith.mulf %10, %7 : vector<8x512xf32>
    %12 = arith.select %9, %7, %11 : vector<8x512xi1>, vector<8x512xf32>
    %c0_8 = arith.constant 0 : index
    %c0_9 = arith.constant 0 : index
    %c0_10 = arith.constant 0 : index
    %c0_11 = arith.constant 0 : index
    %13 = vector.load %arg5[%c0_8, %c0_9, %c0_10, %c0_11] : memref<1x1x8x512xf32, #tpu.memory_space<vmem>>, vector<1x1x8x512xf32>
    %14 = vector.shape_cast %13 : vector<1x1x8x512xf32> to vector<8x512xf32>
    %15 = vector.shape_cast %12 : vector<8x512xf32> to vector<1x1x8x512xf32>
    tpu.vector_store %arg5[%c0_8, %c0_9, %c0_10, %c0_11], %15 {strides = array<i32>} : memref<1x1x8x512xf32, #tpu.memory_space<vmem>>, vector<1x1x8x512xf32>,
    return
  }
  func.func @transform_0(%arg0: i32, %arg1: i32) -> (i32, i32, i32, i32) {
    %c0_i32 = arith.constant 0 : i32
    %c0_i32_0 = arith.constant 0 : i32
    %c0_i32_1 = arith.constant 0 : i32
    return %arg0, %arg1, %c0_i32, %c0_i32_0 : i32, i32, i32, i32
  }
  func.func @transform_1(%arg0: i32, %arg1: i32) -> (i32, i32) {
    %c0_i32 = arith.constant 0 : i32
    %c0_i32_0 = arith.constant 0 : i32
    %c0_i32_1 = arith.constant 0 : i32
    return %c0_i32, %c0_i32_0 : i32, i32
  }
  func.func @transform_2(%arg0: i32, %arg1: i32) -> (i32, i32) {
    %c0_i32 = arith.constant 0 : i32
    %c0_i32_0 = arith.constant 0 : i32
    %c0_i32_1 = arith.constant 0 : i32
    return %c0_i32, %c0_i32_0 : i32, i32
  }
  func.func @transform_3(%arg0: i32, %arg1: i32) -> (i32, i32, i32, i32) {
    %c0_i32 = arith.constant 0 : i32
    %c0_i32_0 = arith.constant 0 : i32
    %c0_i32_1 = arith.constant 0 : i32
    return %arg0, %arg1, %c0_i32, %c0_i32_0 : i32, i32, i32, i32
  }
}

</mosaic_0001>

<bundles_post_ra>
// kernel: tile.18
= control target key start
LH: loop header
LB: loop body
LE: loop exit
PB: predicated region body
PF: predicated region fallthrough
CT: control target
= control target key end

     0   :  { %s28_s0 = inlined_call_operand.vmem [shape: f32[32], index: 0, kind: input, shape index: {}]   ;;  %s29_s1 = inlined_call_operand.vmem [shape: f32[16,32], index: 1, kind: output, shape index: {}]  }
   0x1   :  { %v4_v0 = vld [vmem:[%s28_s0] ss:$0 sm:$0xff] }
   0x2   :  { %5 = vst [vmem:[%s29_s1] sm:$0xff] %v4_v0 }
   0x3   :  { %8 = vst [vmem:[%s29_s1 + $0x8] sm:$0xff] %v4_v0 }

// kernel: tile.19
= control target key start
LH: loop header
LB: loop body
LE: loop exit
PB: predicated region body
PF: predicated region fallthrough
CT: control target
= control target key end

     0   :  { %s56_s8 = smov 96   ;;  %s57_s11 = smov 32   ;;  %vm3_vm0 = vcmask 261120   ;;  %vm9_vm1 = vcmask 1048320   ;;  %vm15_vm2 = vcmask 785920   ;;  %vm21_vm3 = vcmask 523520   ;;  %s93_s0 = inlined_call_operand.vmem [shape: f32[16,32], index: 0, kind: input, shape index: {}]   ;;  %s94_s1 = inlined_call_operand.vmem [shape: f32[1,512], index: 1, kind: output, shape index: {}]  }
   0x1   :  { %v47_v0 = vld [vmem:[%s93_s0 + $0x3] ss:$4 sm:$0xf]   ;;  %v49_v1 = vld [vmem:[%s93_s0 + $0x1] ss:$4 sm:$0xf]  }
   0x2   :  { %7 = vrot.lane.b32.xlu0 %v47_v0, %s56_s8  ;;  %19 = vrot.lane.b32.xlu1 %v49_v1, %s57_s11  ;;  %v48_v2 = vld [vmem:[%s93_s0 + $0x2] ss:$4 sm:$0xf]   ;;  %s58_s14 = smov 64  }
   0x3   :  { %v2_v3 = vld [vmem:[%s93_s0] ss:$4 sm:$0xf]  }
   0x4   :  { %4 = vst.msk [vmem:[#allocation0] ss:$8 sm:$0xf] %vm3_vm0, %v2_v3  }
   0xa   :  { %13 = vrot.lane.b32.xlu0 %v48_v2, %s58_s14 }
  0x74   :  { %v8_v4 = vpop.permute.xlu0 %7   ;;  %v20_v5 = vpop.permute.xlu1 %19  }
  0x75   :  { %10 = vst.msk [vmem:[#allocation0] ss:$8 sm:$0xf] %vm9_vm1, %v8_v4  }
  0x7c   :  { %v14_v6 = vpop.permute.xlu0 %13  }
  0x7d   :  { %16 = vst.msk [vmem:[#allocation0] ss:$8 sm:$0xf] %vm15_vm2, %v14_v6  }
  0x7e   :  { %22 = vst.msk [vmem:[#allocation0] ss:$8 sm:$0xf] %vm21_vm3, %v20_v5  }
  0x85   :  { %v25_v7 = vld [vmem:[#allocation0] sm:$0x1]  ;;  %v30_v8 = vld [vmem:[#allocation0 + $0x8] sm:$0x1]  ;;  %v36_v9 = vld [vmem:[#allocation0 + $0x10] sm:$0x1] }
  0x86   :  { %28 = vst [vmem:[%s94_s1] sm:$0x1] %v25_v7  ;;  %v42_v10 = vld [vmem:[#allocation0 + $0x18] sm:$0x1] }
  0x87   :  { %50 = vst [vmem:[%s94_s1 + $0x1] sm:$0x1] %v30_v8 }
  0x88   :  { %51 = vst [vmem:[%s94_s1 + $0x2] sm:$0x1] %v36_v9 }
  0x89   :  { %52 = vst [vmem:[%s94_s1 + $0x3] sm:$0x1] %v42_v10 }

// kernel: building_block.2
= control target key start
LH: loop header
LB: loop body
LE: loop exit
PB: predicated region body
PF: predicated region fallthrough
CT: control target
= control target key end

     0   :  { %s1806_s12 = smov 0   ;;  %s1808_s13 = smov 0   ;;  %s2488_s0 = inlined_call_operand.vmem [shape: bf16[2,2,10,128], index: 0, kind: input, shape index: {}]   ;;  %s2489_s1 = inlined_call_operand.vmem [shape: bf16[384,512], index: 1, kind: input, shape index: {}]   ;;  %s2490_s2 = inlined_call_operand.vmem [shape: f32[2,2,8,512], index: 2, kind: output, shape index: {0}]   ;;  %s2491_s3 = inlined_call_operand.vmem [shape: f32[2,2,1,1024], index: 3, kind: output, shape index: {1}]  }
   0x1   :  { %s1810_s14 = smov 0   ;;  %s1812_s15 = smov 0  }
   0x2   :  { %s1814_s16 = smov 0  }
   0x3 LB: > { %s23_s17 = sadd.s32 1, %s1776_s14  ;;  %s26_s18 = sadd.s32 1, %s1780_s15  ;;  %s1784_s16 = sphi %s1814_s16, %s14_s16   ;;  %s1780_s15 = sphi %s1812_s15, %s2495_s15   ;;  %s1776_s14 = sphi %s1810_s14, %s2494_s14   ;;  %s1772_s13 = sphi %s1808_s13, %s2493_s13   ;;  %s1768_s12 = sphi %s1806_s12, %s2492_s12  }
   0x4   : > { %p24_p0 = scmp.ge.s32.totalorder %s23_s17, 2  ;;  %p1210_p1 = scmp.ge.s32.totalorder %s1784_s16, 1 }
   0x5   : > { %p162_p2 = scmp.lt.s32.totalorder %s1784_s16, 5 }
   0x6   : > { %s2497_s17 = smov (%p24_p0, %s23_s17), 0  ;;  %s2499_s18 = smov (!%p24_p0, %s26_s18), %s1780_s15 }
   0x7   : > { %p163_p3 = pnand %p1210_p1, %p162_p2  ;;  %p28_p4 = scmp.ge.s32.totalorder %s2499_s18, 2 }
   0x8   : > { %p202_p5 = scmp.lt.s32.totalorder (!%p163_p3), %s1772_s13, 1  ;;  %p204_p6 = scmp.lt.s32.totalorder (!%p163_p3), %s1768_s12, 1 }
   0x9   : > { %s2501_s18 = smov (%p28_p4, %s2499_s18), 0  ;;  %166 = sbr.rel (%p163_p3) target bundleno = 270 (0x10e), region = 28 }
   0xe   : > { %v1337_v0 = vld [vmem:[%s2489_s1 + $0xe0] sm:$0xf]  ;;  %v1640_v1 = vld [vmem:[%s2489_s1 + $0xec] sm:$0xf0]  ;;  %v1638_v9 = vld [vmem:[%s2489_s1 + $0xe4] sm:$0xf] }
   0xf   : > { %v1465_v2 = vld [vmem:[%s2489_s1 + $0x1e0] sm:$0xf]  ;;  %v1338_v3 = vor.u32 %v1640_v1, %v1337_v0  ;;  %v1672_v4 = vld [vmem:[%s2489_s1 + $0x1ec] sm:$0xf0]  ;;  %v1339_v10 = vld [vmem:[%s2489_s1 + $0xf0] sm:$0xf0] }
  0x10   : > { %v1593_v5 = vld [vmem:[%s2489_s1 + $0x2e0] sm:$0xf]  ;;  %v1704_v6 = vld [vmem:[%s2489_s1 + $0x2ec] sm:$0xf0]  ;;  %v1466_v7 = vor.u32 %v1672_v4, %v1465_v2  ;;  %v1342_v12 = vor.u32 %v1638_v9, %v1339_v10  ;;  %v1634_v20 = vld [vmem:[%s2489_s1 + $0xc4] sm:$0xf] }
  0x11   : > { %v1594_v8 = vor.u32 %v1704_v6, %v1593_v5  ;;  %v1321_v11 = vld [vmem:[%s2489_s1 + $0xc0] sm:$0xf]  ;;  %821 = vmatpush.bf16.msra.mxu0 %v1338_v3  ;;  %v1636_v13 = vld [vmem:[%s2489_s1 + $0xcc] sm:$0xf0]  ;;  %v1323_v22 = vld [vmem:[%s2489_s1 + $0xd0] sm:$0xf0] }
  0x12   : > { %v1449_v14 = vld [vmem:[%s2489_s1 + $0x1c0] sm:$0xf]  ;;  %v1668_v15 = vld [vmem:[%s2489_s1 + $0x1cc] sm:$0xf0]  ;;  %834 = vmatpush.bf16.msra.mxu1 %v1466_v7  ;;  %v1322_v16 = vor.u32 %v1636_v13, %v1321_v11  ;;  %860 = vmatpush.bf16.msra.mxu3 %v1342_v12  ;;  %v1326_v25 = vor.u32 %v1634_v20, %v1323_v22  ;;  %v1630_v31 = vld [vmem:[%s2489_s1 + $0xa4] sm:$0xf] }
  0x13   : > { %847 = vmatpush.bf16.msra.mxu2 %v1594_v8  ;;  %v1450_v17 = vor.u32 %v1668_v15, %v1449_v14  ;;  %v1577_v18 = vld [vmem:[%s2489_s1 + $0x2c0] sm:$0xf]  ;;  %v1700_v19 = vld [vmem:[%s2489_s1 + $0x2cc] sm:$0xf0]  ;;  %v1307_v32 = vld [vmem:[%s2489_s1 + $0xb0] sm:$0xf0] }
  0x14   : > { %v1578_v21 = vor.u32 %v1700_v19, %v1577_v18  ;;  %v1305_v23 = vld [vmem:[%s2489_s1 + $0xa0] sm:$0xf]  ;;  %v1632_v24 = vld [vmem:[%s2489_s1 + $0xac] sm:$0xf0]  ;;  %v1310_v38 = vor.u32 %v1630_v31, %v1307_v32  ;;  %v1626_v42 = vld [vmem:[%s2489_s1 + $0x84] sm:$0xf] }
  0x15   : > { %v1433_v26 = vld [vmem:[%s2489_s1 + $0x1a0] sm:$0xf]  ;;  %v1664_v27 = vld [vmem:[%s2489_s1 + $0x1ac] sm:$0xf0]  ;;  %822 = vmatpush.bf16.msra.mxu0 %v1322_v16  ;;  %v1306_v29 = vor.u32 %v1632_v24, %v1305_v23  ;;  %v1291_v43 = vld [vmem:[%s2489_s1 + $0x90] sm:$0xf0] }
  0x16   : > { %v1561_v28 = vld [vmem:[%s2489_s1 + $0x2a0] sm:$0xf]  ;;  %v1696_v30 = vld [vmem:[%s2489_s1 + $0x2ac] sm:$0xf0]  ;;  %835 = vmatpush.bf16.msra.mxu1 %v1450_v17  ;;  %v1434_v33 = vor.u32 %v1664_v27, %v1433_v26  ;;  %861 = vmatpush.bf16.msra.mxu3 %v1326_v25  ;;  %v1294_v50 = vor.u32 %v1626_v42, %v1291_v43  ;;  %v1622_v54 = vld [vmem:[%s2489_s1 + $0x64] sm:$0xf] }
  0x17   : > { %848 = vmatpush.bf16.msra.mxu2 %v1578_v21  ;;  %v1562_v34 = vor.u32 %v1696_v30, %v1561_v28  ;;  %v1289_v35 = vld [vmem:[%s2489_s1 + $0x80] sm:$0xf]  ;;  %v1628_v36 = vld [vmem:[%s2489_s1 + $0x8c] sm:$0xf0]  ;;  %v1275_v55 = vld [vmem:[%s2489_s1 + $0x70] sm:$0xf0] }
  0x18   : > { %v1417_v37 = vld [vmem:[%s2489_s1 + $0x180] sm:$0xf]  ;;  %v1660_v39 = vld [vmem:[%s2489_s1 + $0x18c] sm:$0xf0]  ;;  %v1290_v44 = vor.u32 %v1628_v36, %v1289_v35  ;;  %v1278_v62 = vor.u32 %v1622_v54, %v1275_v55  ;;  %v1618_v2 = vld [vmem:[%s2489_s1 + $0x44] sm:$0xf] }
  0x19   : > { %v1545_v40 = vld [vmem:[%s2489_s1 + $0x280] sm:$0xf]  ;;  %v1692_v41 = vld [vmem:[%s2489_s1 + $0x28c] sm:$0xf0]  ;;  %823 = vmatpush.bf16.msra.mxu0 %v1306_v29  ;;  %v1418_v45 = vor.u32 %v1660_v39, %v1417_v37  ;;  %v1259_v3 = vld [vmem:[%s2489_s1 + $0x50] sm:$0xf0] }
  0x1a   : > { %836 = vmatpush.bf16.msra.mxu1 %v1434_v33  ;;  %v1546_v46 = vor.u32 %v1692_v41, %v1545_v40  ;;  %v1273_v47 = vld [vmem:[%s2489_s1 + $0x60] sm:$0xf]  ;;  %v1624_v48 = vld [vmem:[%s2489_s1 + $0x6c] sm:$0xf0]  ;;  %862 = vmatpush.bf16.msra.mxu3 %v1310_v38  ;;  %v1262_v10 = vor.u32 %v1618_v2, %v1259_v3  ;;  %v1614_v14 = vld [vmem:[%s2489_s1 + $0x24] sm:$0xf] }
  0x1b   : > { %849 = vmatpush.bf16.msra.mxu2 %v1562_v34  ;;  %v1401_v49 = vld [vmem:[%s2489_s1 + $0x160] sm:$0xf]  ;;  %v1656_v51 = vld [vmem:[%s2489_s1 + $0x16c] sm:$0xf0]  ;;  %v1274_v56 = vor.u32 %v1624_v48, %v1273_v47  ;;  %v1243_v15 = vld [vmem:[%s2489_s1 + $0x30] sm:$0xf0] }
  0x1c   : > { %v1529_v52 = vld [vmem:[%s2489_s1 + $0x260] sm:$0xf]  ;;  %v1688_v53 = vld [vmem:[%s2489_s1 + $0x26c] sm:$0xf0]  ;;  %v1402_v57 = vor.u32 %v1656_v51, %v1401_v49  ;;  %v1246_v24 = vor.u32 %v1614_v14, %v1243_v15  ;;  %v1610_v26 = vld [vmem:[%s2489_s1 + $0x4] sm:$0xf] }
  0x1d   : > { %824 = vmatpush.bf16.msra.mxu0 %v1290_v44  ;;  %v1530_v58 = vor.u32 %v1688_v53, %v1529_v52  ;;  %v1257_v59 = vld [vmem:[%s2489_s1 + $0x40] sm:$0xf]  ;;  %v1620_v60 = vld [vmem:[%s2489_s1 + $0x4c] sm:$0xf0]  ;;  %v1227_v27 = vld [vmem:[%s2489_s1 + $0x10] sm:$0xf0] }
  0x1e   : > { %837 = vmatpush.bf16.msra.mxu1 %v1418_v45  ;;  %v1385_v61 = vld [vmem:[%s2489_s1 + $0x140] sm:$0xf]  ;;  %863 = vmatpush.bf16.msra.mxu3 %v1294_v50  ;;  %v1652_v63 = vld [vmem:[%s2489_s1 + $0x14c] sm:$0xf0]  ;;  %v1258_v4 = vor.u32 %v1620_v60, %v1257_v59  ;;  %v1670_v28 = vld [vmem:[%s2489_s1 + $0x1e4] sm:$0xf]  ;;  %v1230_v39 = vor.u32 %v1610_v26, %v1227_v27 }
  0x1f   : > { %850 = vmatpush.bf16.msra.mxu2 %v1546_v46  ;;  %v1513_v0 = vld [vmem:[%s2489_s1 + $0x240] sm:$0xf]  ;;  %v1684_v1 = vld [vmem:[%s2489_s1 + $0x24c] sm:$0xf0]  ;;  %v1386_v5 = vor.u32 %v1652_v63, %v1385_v61  ;;  %v1467_v29 = vld [vmem:[%s2489_s1 + $0x1f0] sm:$0xf0] }
  0x20   : > { %v1514_v6 = vor.u32 %v1684_v1, %v1513_v0  ;;  %v1241_v7 = vld [vmem:[%s2489_s1 + $0x20] sm:$0xf]  ;;  %v1616_v8 = vld [vmem:[%s2489_s1 + $0x2c] sm:$0xf0]  ;;  %v1702_v30 = vld [vmem:[%s2489_s1 + $0x2e4] sm:$0xf]  ;;  %v1470_v40 = vor.u32 %v1670_v28, %v1467_v29 }
  0x21   : > { %825 = vmatpush.bf16.msra.mxu0 %v1274_v56  ;;  %v1369_v9 = vld [vmem:[%s2489_s1 + $0x120] sm:$0xf]  ;;  %v1648_v11 = vld [vmem:[%s2489_s1 + $0x12c] sm:$0xf0]  ;;  %v1242_v16 = vor.u32 %v1616_v8, %v1241_v7  ;;  %v1595_v32 = vld [vmem:[%s2489_s1 + $0x2f0] sm:$0xf0] }
  0x22   : > { %838 = vmatpush.bf16.msra.mxu1 %v1402_v57  ;;  %864 = vmatpush.bf16.msra.mxu3 %v1278_v62  ;;  %v1497_v12 = vld [vmem:[%s2489_s1 + $0x220] sm:$0xf]  ;;  %v1680_v13 = vld [vmem:[%s2489_s1 + $0x22c] sm:$0xf0]  ;;  %v1370_v19 = vor.u32 %v1648_v11, %v1369_v9  ;;  %v1345_v33 = vld [vmem:[%s2489_s1 + $0xe8] sm:$0xf]  ;;  %v1598_v41 = vor.u32 %v1702_v30, %v1595_v32 }
  0x23   : > { %851 = vmatpush.bf16.msra.mxu2 %v1530_v58  ;;  %v1225_v17 = vld [vmem:[%s2489_s1] sm:$0xf]  ;;  %v1612_v18 = vld [vmem:[%s2489_s1 + $0xc] sm:$0xf0]  ;;  %v1498_v20 = vor.u32 %v1680_v13, %v1497_v12  ;;  %v1641_v34 = vld [vmem:[%s2489_s1 + $0xf4] sm:$0xf0] }
  0x24   : > { %v1353_v21 = vld [vmem:[%s2489_s1 + $0x100] sm:$0xf]  ;;  %v1644_v22 = vld [vmem:[%s2489_s1 + $0x10c] sm:$0xf0]  ;;  %v1226_v31 = vor.u32 %v1612_v18, %v1225_v17  ;;  %v1473_v37 = vld [vmem:[%s2489_s1 + $0x1e8] sm:$0xf]  ;;  %v1346_v42 = vor.u32 %v1641_v34, %v1345_v33 }
  0x25   : > { %826 = vmatpush.bf16.msra.mxu0 %v1258_v4  ;;  %v1481_v23 = vld [vmem:[%s2489_s1 + $0x200] sm:$0xf]  ;;  %v1676_v25 = vld [vmem:[%s2489_s1 + $0x20c] sm:$0xf0]  ;;  %v1354_v35 = vor.u32 %v1644_v22, %v1353_v21  ;;  %v1673_v38 = vld [vmem:[%s2489_s1 + $0x1f4] sm:$0xf0] }
  0x26   : > { %839 = vmatpush.bf16.msra.mxu1 %v1386_v5  ;;  %865 = vmatpush.bf16.msra.mxu3 %v1262_v10  ;;  %v1482_v36 = vor.u32 %v1676_v25, %v1481_v23  ;;  %v1666_v43 = vld [vmem:[%s2489_s1 + $0x1c4] sm:$0xf]  ;;  %v1451_v44 = vld [vmem:[%s2489_s1 + $0x1d0] sm:$0xf0]  ;;  %v1474_v46 = vor.u32 %v1673_v38, %v1473_v37  ;;  %v1329_v48 = vld [vmem:[%s2489_s1 + $0xc8] sm:$0xf] }
  0x27   : > { %852 = vmatpush.bf16.msra.mxu2 %v1514_v6  ;;  %v1698_v45 = vld [vmem:[%s2489_s1 + $0x2c4] sm:$0xf]  ;;  %v1579_v47 = vld [vmem:[%s2489_s1 + $0x2d0] sm:$0xf0]  ;;  %v1637_v49 = vld [vmem:[%s2489_s1 + $0xd4] sm:$0xf0]  ;;  %v1454_v52 = vor.u32 %v1666_v43, %v1451_v44 }
  0x28   : > { %v1457_v50 = vld [vmem:[%s2489_s1 + $0x1c8] sm:$0xf]  ;;  %v1669_v51 = vld [vmem:[%s2489_s1 + $0x1d4] sm:$0xf0]  ;;  %v1662_v53 = vld [vmem:[%s2489_s1 + $0x1a4] sm:$0xf]  ;;  %v1582_v55 = vor.u32 %v1698_v45, %v1579_v47  ;;  %v1330_v56 = vor.u32 %v1637_v49, %v1329_v48 }
  0x29   : > { %827 = vmatpush.bf16.msra.mxu0 %v1242_v16  ;;  %v1435_v54 = vld [vmem:[%s2489_s1 + $0x1b0] sm:$0xf0]  ;;  %v1694_v57 = vld [vmem:[%s2489_s1 + $0x2a4] sm:$0xf]  ;;  %s2503_s13 = smov (!%p202_p5, %s1772_s13), 1  ;;  %v1458_v59 = vor.u32 %v1669_v51, %v1457_v50  ;;  %s2505_s12 = smov (!%p204_p6, %s1768_s12), 1 }
  0x2a   : > { %840 = vmatpush.bf16.msra.mxu1 %v1370_v19  ;;  %866 = vmatpush.bf16.msra.mxu3 %v1246_v24  ;;  %v1563_v58 = vld [vmem:[%s2489_s1 + $0x2b0] sm:$0xf0]  ;;  %v1313_v60 = vld [vmem:[%s2489_s1 + $0xa8] sm:$0xf]  ;;  %v1633_v61 = vld [vmem:[%s2489_s1 + $0xb4] sm:$0xf0]  ;;  %v1438_v0 = vor.u32 %v1662_v53, %v1435_v54 }
  0x2b   : > { %853 = vmatpush.bf16.msra.mxu2 %v1498_v20  ;;  %v1441_v62 = vld [vmem:[%s2489_s1 + $0x1a8] sm:$0xf]  ;;  %v1665_v63 = vld [vmem:[%s2489_s1 + $0x1b4] sm:$0xf0]  ;;  %s1212_s8 = sshll.u32 %s2503_s13, 2  ;;  %s1218_s9 = sshll.u32 %s2503_s13, 4  ;;  %v1566_v2 = vor.u32 %v1694_v57, %v1563_v58  ;;  %v1314_v3 = vor.u32 %v1633_v61, %v1313_v60 }
  0x2c   : > { %v1658_v1 = vld [vmem:[%s2489_s1 + $0x184] sm:$0xf]  ;;  %s1211_s19 = sshll.u32 %s2505_s12, 1  ;;  %s1217_s20 = sshll.u32 %s2505_s12, 3  ;;  %v1419_v4 = vld [vmem:[%s2489_s1 + $0x190] sm:$0xf0]  ;;  %v1442_v7 = vor.u32 %v1665_v63, %v1441_v62 }
  0x2d   : > { %828 = vmatpush.bf16.msra.mxu0 %v1226_v31  ;;  %v1690_v5 = vld [vmem:[%s2489_s1 + $0x284] sm:$0xf]  ;;  %v1547_v6 = vld [vmem:[%s2489_s1 + $0x290] sm:$0xf0]  ;;  %s208_s27 = sadd.s32 %s1212_s8, %s1211_s19  ;;  %s2130_s28 = sadd.s32 %s1218_s9, %s1217_s20  ;;  %v1297_v8 = vld [vmem:[%s2489_s1 + $0x88] sm:$0xf]  ;;  %v1422_v13 = vor.u32 %v1658_v1, %v1419_v4 }
  0x2e   : > { %841 = vmatpush.bf16.msra.mxu1 %v1354_v35  ;;  %867 = vmatpush.bf16.msra.mxu3 %v1230_v39  ;;  %v1629_v9 = vld [vmem:[%s2489_s1 + $0x94] sm:$0xf0]  ;;  %s1213_s6 = sshll.u32 %s208_s27, 2  ;;  %v1425_v10 = vld [vmem:[%s2489_s1 + $0x188] sm:$0xf]  ;;  %v1550_v17 = vor.u32 %v1690_v5, %v1547_v6  ;;  %s1214_s25 = sshll.u32 %s2505_s12, 2 }
  0x2f   : > { %854 = vmatpush.bf16.msra.mxu2 %v1482_v36  ;;  %v1661_v11 = vld [vmem:[%s2489_s1 + $0x194] sm:$0xf0]  ;;  %s210_s19 = scalar_lea.vmem %s2488_s0, %s1213_s6  ;;  %v1654_v12 = vld [vmem:[%s2489_s1 + $0x164] sm:$0xf]  ;;  %v1298_v18 = vor.u32 %v1629_v9, %v1297_v8  ;;  %v1403_v20 = vld [vmem:[%s2489_s1 + $0x170] sm:$0xf0] }
  0x30   : > { %v2150_v14 = vld [vmem:[%s210_s19] sm:$0xf]  ;;  %v1609_v16 = vld [vmem:[%s210_s19] sm:$0x10]  ;;  %v1531_v22 = vld [vmem:[%s2489_s1 + $0x270] sm:$0xf0]  ;;  %v1426_v23 = vor.u32 %v1661_v11, %v1425_v10  ;;  %v1406_v31 = vor.u32 %v1654_v12, %v1403_v20 }
  0x31   : > { %873 = vmatpush.bf16.msrb.mxu0 %v1470_v40  ;;  %v1221_v15 = vld [vmem:[%s210_s19] sm:$0xf]  ;;  %v1686_v21 = vld [vmem:[%s2489_s1 + $0x264] sm:$0xf]  ;;  %v1281_v24 = vld [vmem:[%s2489_s1 + $0x68] sm:$0xf]  ;;  %868 = vmatmul.bf16.vlgmr.msra.gmra.mxu3 %v2150_v14 }
  0x32   : > { %886 = vmatpush.bf16.msrb.mxu1 %v1598_v41  ;;  %912 = vmatpush.bf16.msrb.mxu3 %v1474_v46  ;;  %v1222_v19 = vor.u32 %v1609_v16, %v1221_v15  ;;  %v1625_v25 = vld [vmem:[%s2489_s1 + $0x74] sm:$0xf0]  ;;  %v1409_v26 = vld [vmem:[%s2489_s1 + $0x168] sm:$0xf]  ;;  %v1650_v32 = vld [vmem:[%s2489_s1 + $0x144] sm:$0xf]  ;;  %v1534_v33 = vor.u32 %v1686_v21, %v1531_v22 }
  0x33   : > { %899 = vmatpush.bf16.msrb.mxu2 %v1346_v42  ;;  %829 = vmatmul.bf16.vlgmr.msra.gmra.mxu0 %v2150_v14  ;;  %v1657_v27 = vld [vmem:[%s2489_s1 + $0x174] sm:$0xf0]  ;;  %v1282_v34 = vor.u32 %v1625_v25, %v1281_v24  ;;  %v1387_v36 = vld [vmem:[%s2489_s1 + $0x150] sm:$0xf0]  ;;  %v1682_v37 = vld [vmem:[%s2489_s1 + $0x244] sm:$0xf] }
  0x34   : > { %v236_v28 = vshrl.u32 %v1222_v19, 16  ;;  %v238_v29 = vshll.u32 %v1222_v19, 16  ;;  %v2174_v30 = vrot.slane %v1222_v19, 1  ;;  %v1410_v38 = vor.u32 %v1657_v27, %v1409_v26  ;;  %v1515_v39 = vld [vmem:[%s2489_s1 + $0x250] sm:$0xf0]  ;;  %s1215_s26 = sshll.u32 %s2503_s13, 3 }
  0x35   : > { %874 = vmatpush.bf16.msrb.mxu0 %v1454_v52  ;;  %v1265_v40 = vld [vmem:[%s2489_s1 + $0x48] sm:$0xf]  ;;  %v1621_v41 = vld [vmem:[%s2489_s1 + $0x54] sm:$0xf0]  ;;  %v1390_v45 = vor.u32 %v1650_v32, %v1387_v36  ;;  %v1518_v46 = vor.u32 %v1682_v37, %v1515_v39  ;;  %v1646_v48 = vld [vmem:[%s2489_s1 + $0x124] sm:$0xf]  ;;  %s2349_s7 = sadd.s32 %s1215_s26, %s1214_s25  ;;  %s227_s26 = scalar_lea.vmem %s2491_s3, %s2130_s28 }
  0x36   : > { %887 = vmatpush.bf16.msrb.mxu1 %v1582_v55  ;;  %913 = vmatpush.bf16.msrb.mxu3 %v1458_v59  ;;  %v240_v35 = vrot.slane %v238_v29, 1  ;;  %v1393_v43 = vld [vmem:[%s2489_s1 + $0x148] sm:$0xf]  ;;  %v1653_v44 = vld [vmem:[%s2489_s1 + $0x154] sm:$0xf0]  ;;  %v1266_v47 = vor.u32 %v1621_v41, %v1265_v40  ;;  %s1216_s20 = sshll.u32 %s2349_s7, 3 }
  0x37   : > { %900 = vmatpush.bf16.msrb.mxu2 %v1330_v56  ;;  %v1371_v49 = vld [vmem:[%s2489_s1 + $0x130] sm:$0xf0]  ;;  %v1678_v50 = vld [vmem:[%s2489_s1 + $0x224] sm:$0xf]  ;;  %v1394_v51 = vor.u32 %v1653_v44, %v1393_v43  ;;  %v1249_v53 = vld [vmem:[%s2489_s1 + $0x28] sm:$0xf]  ;;  %s2461_s24 = scalar_lea.vmem %s2490_s2, %s1216_s20 }
  0x38   : > { %855 = vmatmul.bf16.vlgmr.msra.gmra.mxu2 %v2174_v30  ;;  %v2196_v42 = vor.u32 %v240_v35, %v236_v28  ;;  %v1499_v52 = vld [vmem:[%s2489_s1 + $0x230] sm:$0xf0]  ;;  %v1617_v54 = vld [vmem:[%s2489_s1 + $0x34] sm:$0xf0]  ;;  %v1377_v55 = vld [vmem:[%s2489_s1 + $0x128] sm:$0xf]  ;;  %v1374_v57 = vor.u32 %v1646_v48, %v1371_v49 }
  0x39   : > { %875 = vmatpush.bf16.msrb.mxu0 %v1438_v0  ;;  %v1649_v56 = vld [vmem:[%s2489_s1 + $0x134] sm:$0xf0]  ;;  %v1642_v58 = vld [vmem:[%s2489_s1 + $0x104] sm:$0xf]  ;;  %v1355_v59 = vld [vmem:[%s2489_s1 + $0x110] sm:$0xf0]  ;;  %v1502_v60 = vor.u32 %v1678_v50, %v1499_v52  ;;  %v1250_v61 = vor.u32 %v1617_v54, %v1249_v53 }
  0x3a   : > { %888 = vmatpush.bf16.msrb.mxu1 %v1566_v2  ;;  %914 = vmatpush.bf16.msrb.mxu3 %v1442_v7  ;;  %v1674_v62 = vld [vmem:[%s2489_s1 + $0x204] sm:$0xf]  ;;  %v1483_v63 = vld [vmem:[%s2489_s1 + $0x210] sm:$0xf0]  ;;  %v1233_v0 = vld [vmem:[%s2489_s1 + $0x8] sm:$0xf]  ;;  %v1378_v1 = vor.u32 %v1649_v56, %v1377_v55  ;;  %v1358_v8 = vor.u32 %v1642_v58, %v1355_v59 }
  0x3b   : > { %901 = vmatpush.bf16.msrb.mxu2 %v1314_v3  ;;  %842 = vmatmul.bf16.vlgmr.msra.gmra.mxu1 %v2196_v42  ;;  %v1613_v2 = vld [vmem:[%s2489_s1 + $0x14] sm:$0xf0]  ;;  %v1361_v3 = vld [vmem:[%s2489_s1 + $0x108] sm:$0xf]  ;;  %v1639_v7 = vld [vmem:[%s2489_s1 + $0xec] sm:$0xf]  ;;  %v1486_v12 = vor.u32 %v1674_v62, %v1483_v63 }
  0x3c   : > { %v1645_v4 = vld [vmem:[%s2489_s1 + $0x114] sm:$0xf0]  ;;  %v1601_v5 = vld [vmem:[%s2489_s1 + $0x2e8] sm:$0xf]  ;;  %v1347_v9 = vld [vmem:[%s2489_s1 + $0xf8] sm:$0xf0] }
  0x3d   : > { %876 = vmatpush.bf16.msrb.mxu0 %v1422_v13  ;;  %v1705_v6 = vld [vmem:[%s2489_s1 + $0x2f4] sm:$0xf0]  ;;  %v1671_v10 = vld [vmem:[%s2489_s1 + $0x1ec] sm:$0xf]  ;;  %v1475_v11 = vld [vmem:[%s2489_s1 + $0x1f8] sm:$0xf0]  ;;  %v1234_v13 = vor.u32 %v1613_v2, %v1233_v0  ;;  %v1350_v19 = vor.u32 %v1639_v7, %v1347_v9 }
  0x3e   : > { %889 = vmatpush.bf16.msrb.mxu1 %v1550_v17  ;;  %915 = vmatpush.bf16.msrb.mxu3 %v1426_v23  ;;  %v1703_v15 = vld [vmem:[%s2489_s1 + $0x2ec] sm:$0xf]  ;;  %v1603_v16 = vld [vmem:[%s2489_s1 + $0x2f8] sm:$0xf0]  ;;  %v1362_v17 = vor.u32 %v1645_v4, %v1361_v3  ;;  %v1478_v20 = vor.u32 %v1671_v10, %v1475_v11  ;;  %v1585_v21 = vld [vmem:[%s2489_s1 + $0x2c8] sm:$0xf] }
  0x3f   : > { %902 = vmatpush.bf16.msrb.mxu2 %v1298_v18  ;;  %v1602_v18 = vor.u32 %v1705_v6, %v1601_v5  ;;  %v1701_v22 = vld [vmem:[%s2489_s1 + $0x2d4] sm:$0xf0]  ;;  %v1635_v23 = vld [vmem:[%s2489_s1 + $0xcc] sm:$0xf]  ;;  %v1606_v24 = vor.u32 %v1703_v15, %v1603_v16  ;;  %v1331_v25 = vld [vmem:[%s2489_s1 + $0xd8] sm:$0xf0] }
  0x40   : > { %v1667_v26 = vld [vmem:[%s2489_s1 + $0x1cc] sm:$0xf]  ;;  %v1459_v27 = vld [vmem:[%s2489_s1 + $0x1d8] sm:$0xf0]  ;;  %v1334_v32 = vor.u32 %v1635_v23, %v1331_v25  ;;  %v1697_v35 = vld [vmem:[%s2489_s1 + $0x2b4] sm:$0xf0] }
  0x41   : > { %877 = vmatpush.bf16.msrb.mxu0 %v1406_v31  ;;  %v1699_v28 = vld [vmem:[%s2489_s1 + $0x2cc] sm:$0xf]  ;;  %v1587_v29 = vld [vmem:[%s2489_s1 + $0x2d8] sm:$0xf0]  ;;  %v1586_v31 = vor.u32 %v1701_v22, %v1585_v21  ;;  %v1693_v48 = vld [vmem:[%s2489_s1 + $0x294] sm:$0xf0] }
  0x42   : > { %890 = vmatpush.bf16.msrb.mxu1 %v1534_v33  ;;  %916 = vmatpush.bf16.msrb.mxu3 %v1410_v38  ;;  %v1462_v33 = vor.u32 %v1667_v26, %v1459_v27  ;;  %v1631_v36 = vld [vmem:[%s2489_s1 + $0xac] sm:$0xf]  ;;  %v1590_v37 = vor.u32 %v1699_v28, %v1587_v29  ;;  %v1315_v38 = vld [vmem:[%s2489_s1 + $0xb8] sm:$0xf0]  ;;  %v1537_v59 = vld [vmem:[%s2489_s1 + $0x268] sm:$0xf] }
  0x43   : > { %903 = vmatpush.bf16.msrb.mxu2 %v1282_v34  ;;  %v1569_v34 = vld [vmem:[%s2489_s1 + $0x2a8] sm:$0xf]  ;;  %v1663_v39 = vld [vmem:[%s2489_s1 + $0x1ac] sm:$0xf]  ;;  %v1443_v40 = vld [vmem:[%s2489_s1 + $0x1b8] sm:$0xf0] }
  0x44   : > { %v1695_v41 = vld [vmem:[%s2489_s1 + $0x2ac] sm:$0xf]  ;;  %v1571_v43 = vld [vmem:[%s2489_s1 + $0x2b8] sm:$0xf0]  ;;  %v1570_v44 = vor.u32 %v1697_v35, %v1569_v34  ;;  %v1521_v7 = vld [vmem:[%s2489_s1 + $0x248] sm:$0xf] }
  0x45   : > { %878 = vmatpush.bf16.msrb.mxu0 %v1390_v45  ;;  %v1553_v45 = vld [vmem:[%s2489_s1 + $0x288] sm:$0xf]  ;;  %v1627_v49 = vld [vmem:[%s2489_s1 + $0x8c] sm:$0xf]  ;;  %v1574_v50 = vor.u32 %v1695_v41, %v1571_v43  ;;  %v1427_v53 = vld [vmem:[%s2489_s1 + $0x198] sm:$0xf0] }
  0x46   : > { %891 = vmatpush.bf16.msrb.mxu1 %v1518_v46  ;;  %917 = vmatpush.bf16.msrb.mxu3 %v1394_v51  ;;  %v1318_v46 = vor.u32 %v1631_v36, %v1315_v38  ;;  %v1299_v51 = vld [vmem:[%s2489_s1 + $0x98] sm:$0xf0]  ;;  %v1659_v52 = vld [vmem:[%s2489_s1 + $0x18c] sm:$0xf]  ;;  %v1554_v56 = vor.u32 %v1693_v48, %v1553_v45  ;;  %v1681_v21 = vld [vmem:[%s2489_s1 + $0x234] sm:$0xf0] }
  0x47   : > { %904 = vmatpush.bf16.msrb.mxu2 %v1266_v47  ;;  %v1446_v47 = vor.u32 %v1663_v39, %v1443_v40  ;;  %v1691_v54 = vld [vmem:[%s2489_s1 + $0x28c] sm:$0xf]  ;;  %v1555_v55 = vld [vmem:[%s2489_s1 + $0x298] sm:$0xf0]  ;;  %v1430_v58 = vor.u32 %v1659_v52, %v1427_v53  ;;  %v1677_v34 = vld [vmem:[%s2489_s1 + $0x214] sm:$0xf0] }
  0x48   : > { %v1558_v62 = vor.u32 %v1691_v54, %v1555_v55  ;;  %v1283_v63 = vld [vmem:[%s2489_s1 + $0x78] sm:$0xf0]  ;;  %v1655_v0 = vld [vmem:[%s2489_s1 + $0x16c] sm:$0xf]  ;;  %vm1048_vm0 = vcmask 1040384   ;;  %vm1054_vm1 = vcmask 1044484  }
  0x49   : > { %879 = vmatpush.bf16.msrb.mxu0 %v1374_v57  ;;  %v1302_v57 = vor.u32 %v1627_v49, %v1299_v51  ;;  %v1687_v2 = vld [vmem:[%s2489_s1 + $0x26c] sm:$0xf]  ;;  %v1539_v3 = vld [vmem:[%s2489_s1 + $0x278] sm:$0xf0]  ;;  %vm1050_vm2 = vcmask 1042434   ;;  %vm1052_vm3 = vcmask 1041408  }
  0x4a   : > { %892 = vmatpush.bf16.msrb.mxu1 %v1502_v60  ;;  %918 = vmatpush.bf16.msrb.mxu3 %v1378_v1  ;;  %v1689_v60 = vld [vmem:[%s2489_s1 + $0x274] sm:$0xf0]  ;;  %v1411_v1 = vld [vmem:[%s2489_s1 + $0x178] sm:$0xf0]  ;;  %v1619_v9 = vld [vmem:[%s2489_s1 + $0x4c] sm:$0xf]  ;;  %v1542_v10 = vor.u32 %v1687_v2, %v1539_v3 }
  0x4b   : > { %905 = vmatpush.bf16.msrb.mxu2 %v1250_v61  ;;  %v1623_v61 = vld [vmem:[%s2489_s1 + $0x6c] sm:$0xf]  ;;  %v1538_v4 = vor.u32 %v1689_v60, %v1537_v59  ;;  %v1414_v6 = vor.u32 %v1655_v0, %v1411_v1  ;;  %v1267_v11 = vld [vmem:[%s2489_s1 + $0x58] sm:$0xf0]  ;;  %vm1056_vm4 = vcmask 1046534   ;;  %vm1058_vm5 = vcmask 1045508  }
  0x4c   : > { %v1286_v5 = vor.u32 %v1623_v61, %v1283_v63  ;;  %v1683_v15 = vld [vmem:[%s2489_s1 + $0x24c] sm:$0xf]  ;;  %v1523_v16 = vld [vmem:[%s2489_s1 + $0x258] sm:$0xf0]  ;;  %vm1060_vm6 = vcmask 1043456  }
  0x4d   : > { %880 = vmatpush.bf16.msrb.mxu0 %v1358_v8  ;;  %v1685_v8 = vld [vmem:[%s2489_s1 + $0x254] sm:$0xf0]  ;;  %v1615_v22 = vld [vmem:[%s2489_s1 + $0x2c] sm:$0xf]  ;;  %v1526_v23 = vor.u32 %v1683_v15, %v1523_v16  ;;  %v1379_v26 = vld [vmem:[%s2489_s1 + $0x138] sm:$0xf0] }
  0x4e   : > { %893 = vmatpush.bf16.msrb.mxu1 %v1486_v12  ;;  %919 = vmatpush.bf16.msrb.mxu3 %v1362_v17  ;;  %v1651_v12 = vld [vmem:[%s2489_s1 + $0x14c] sm:$0xf]  ;;  %v1522_v17 = vor.u32 %v1685_v8, %v1521_v7  ;;  %v1507_v28 = vld [vmem:[%s2489_s1 + $0x238] sm:$0xf0] }
  0x4f   : > { %906 = vmatpush.bf16.msrb.mxu2 %v1234_v13  ;;  %v1395_v13 = vld [vmem:[%s2489_s1 + $0x158] sm:$0xf0]  ;;  %v1647_v25 = vld [vmem:[%s2489_s1 + $0x12c] sm:$0xf] }
  0x50   : > { %881 = vmatmul.bf16.vlgmr.msrb.gmra.mxu0 %v2196_v42  ;;  %v1679_v27 = vld [vmem:[%s2489_s1 + $0x22c] sm:$0xf]  ;;  %v1363_v39 = vld [vmem:[%s2489_s1 + $0x118] sm:$0xf0] }
  0x51   : > { %925 = vmatpush.bf16.msra.mxu0 %v1602_v18  ;;  %920 = vmatmul.bf16.vlgmr.msrb.gmra.mxu3 %v2196_v42  ;;  %v1270_v18 = vor.u32 %v1619_v9, %v1267_v11  ;;  %v1611_v35 = vld [vmem:[%s2489_s1 + $0xc] sm:$0xf]  ;;  %v1510_v36 = vor.u32 %v1679_v27, %v1507_v28  ;;  %v1491_v41 = vld [vmem:[%s2489_s1 + $0x218] sm:$0xf0] }
  0x52   : > { %938 = vmatpush.bf16.msra.mxu1 %v1350_v19  ;;  %964 = vmatpush.bf16.msra.mxu3 %v1606_v24  ;;  %v1398_v19 = vor.u32 %v1651_v12, %v1395_v13  ;;  %v1251_v24 = vld [vmem:[%s2489_s1 + $0x38] sm:$0xf0]  ;;  %v1643_v38 = vld [vmem:[%s2489_s1 + $0x10c] sm:$0xf] }
  0x53   : > { %951 = vmatpush.bf16.msra.mxu2 %v1478_v20  ;;  %894 = vmatmul.bf16.vlgmr.msrb.gmra.mxu1 %v2174_v30  ;;  %v1505_v20 = vld [vmem:[%s2489_s1 + $0x228] sm:$0xf]  ;;  %v1675_v40 = vld [vmem:[%s2489_s1 + $0x20c] sm:$0xf]  ;;  %v1366_v45 = vor.u32 %v1643_v38, %v1363_v39 }
  0x54   : > { %907 = vmatmul.bf16.vlgmr.msrb.gmra.mxu2 %v2150_v14  ;;  %v1506_v29 = vor.u32 %v1681_v21, %v1505_v20 }
  0x55   : > { %926 = vmatpush.bf16.msra.mxu0 %v1586_v31  ;;  %v1254_v31 = vor.u32 %v1615_v22, %v1251_v24 }
  0x56   : > { %939 = vmatpush.bf16.msra.mxu1 %v1334_v32  ;;  %965 = vmatpush.bf16.msra.mxu3 %v1590_v37  ;;  %v1382_v32 = vor.u32 %v1647_v25, %v1379_v26  ;;  %v1235_v37 = vld [vmem:[%s2489_s1 + $0x18] sm:$0xf0] }
  0x57   : > { %952 = vmatpush.bf16.msra.mxu2 %v1462_v33  ;;  %v1489_v33 = vld [vmem:[%s2489_s1 + $0x208] sm:$0xf] }
  0x58   : > { %v1490_v43 = vor.u32 %v1677_v34, %v1489_v33 }
  0x59   : > { %927 = vmatpush.bf16.msra.mxu0 %v1570_v44  ;;  %v1238_v44 = vor.u32 %v1611_v35, %v1235_v37 }
  0x5a   : > { %940 = vmatpush.bf16.msra.mxu1 %v1318_v46  ;;  %966 = vmatpush.bf16.msra.mxu3 %v1574_v50  ;;  %v1494_v46 = vor.u32 %v1675_v40, %v1491_v41 }
  0x5b   : > { %953 = vmatpush.bf16.msra.mxu2 %v1446_v47 }
  0x5d   : > { %928 = vmatpush.bf16.msra.mxu0 %v1554_v56 }
  0x5e   : > { %941 = vmatpush.bf16.msra.mxu1 %v1302_v57  ;;  %967 = vmatpush.bf16.msra.mxu3 %v1558_v62 }
  0x5f   : > { %954 = vmatpush.bf16.msra.mxu2 %v1430_v58 }
  0x61   : > { %929 = vmatpush.bf16.msra.mxu0 %v1538_v4 }
  0x62   : > { %942 = vmatpush.bf16.msra.mxu1 %v1286_v5  ;;  %968 = vmatpush.bf16.msra.mxu3 %v1542_v10 }
  0x63   : > { %955 = vmatpush.bf16.msra.mxu2 %v1414_v6 }
  0x65   : > { %930 = vmatpush.bf16.msra.mxu0 %v1522_v17 }
  0x66   : > { %943 = vmatpush.bf16.msra.mxu1 %v1270_v18  ;;  %969 = vmatpush.bf16.msra.mxu3 %v1526_v23 }
  0x67   : > { %956 = vmatpush.bf16.msra.mxu2 %v1398_v19 }
  0x69   : > { %931 = vmatpush.bf16.msra.mxu0 %v1506_v29 }
  0x6a   : > { %944 = vmatpush.bf16.msra.mxu1 %v1254_v31  ;;  %970 = vmatpush.bf16.msra.mxu3 %v1510_v36 }
  0x6b   : > { %957 = vmatpush.bf16.msra.mxu2 %v1382_v32 }
  0x6d   : > { %932 = vmatpush.bf16.msra.mxu0 %v1490_v43 }
  0x6e   : > { %945 = vmatpush.bf16.msra.mxu1 %v1238_v44  ;;  %971 = vmatpush.bf16.msra.mxu3 %v1494_v46 }
  0x6f   : > { %958 = vmatpush.bf16.msra.mxu2 %v1366_v45 }
  0x70   : > { %933 = vmatmul.bf16.vlgmr.msra.gmra.mxu0 %v2174_v30 }
  0x71   : > { %946 = vmatmul.bf16.vlgmr.msra.gmra.mxu1 %v2150_v14  ;;  %972 = vmatmul.bf16.vlgmr.msra.gmra.mxu3 %v2174_v30 }
  0x72   : > { %959 = vmatmul.bf16.vlgmr.msra.gmra.mxu2 %v2196_v42 }
  0xb0   : > { %v830_v47 = vpop.f32.mrf.mxu0 }
  0xb4   : > { %v869_v48 = vpop.f32.mrf.mxu3 }
  0xb8   : > { %v843_v49 = vpop.f32.mrf.mxu1  ;;  %v832_v50 = vpop.f32.mrf.mxu0 }
  0xb9   : > { %v844_v51 = vadd.f32 %v843_v49, %v830_v47 }
  0xbb   : > { %v856_v52 = vpop.f32.mrf.mxu2 }
  0xbc   : > { %v857_v53 = vadd.f32 %v856_v52, %v844_v51  ;;  %v871_v14 = vpop.f32.mrf.mxu3 }
  0xbe   : > { %977 = vst [vmem:[%s2461_s24] sm:$0xff] %v857_v53  ;;  %v1005_v1 = vmul.f32 %v857_v53, %v857_v53  ;;  %v981_v13 = vrot.slane %v857_v53, 4 }
  0xc0   : > { %v845_v42 = vpop.f32.mrf.mxu1  ;;  %v1009_v6 = vrot.slane %v1005_v1, 4  ;;  %v982_v26 = vadd.f32 %v981_v13, %v857_v53 }
  0xc2   : > { %v1010_v15 = vadd.f32 %v1009_v6, %v1005_v1  ;;  %v983_v37 = vrot.slane %v982_v26, 2 }
  0xc3   : > { %v858_v54 = vpop.f32.mrf.mxu2 }
  0xc4   : > { %v1011_v27 = vrot.slane %v1010_v15, 2  ;;  %v984_v50 = vadd.f32 %v983_v37, %v982_v26 }
  0xc6   : > { %v1012_v38 = vadd.f32 %v1011_v27, %v1010_v15 }
  0xc8   : > { %v1013_v51 = vrot.slane %v1012_v38, 1 }
  0xcd   : > { %v882_v30 = vpop.f32.mrf.mxu0 }
  0xce   : > { %v883_v55 = vadd.f32 %v882_v30, %v869_v48 }
  0xd0   : > { %v895_v56 = vpop.f32.mrf.mxu1 }
  0xd1   : > { %v896_v57 = vadd.f32 %v895_v56, %v883_v55 }
  0xd3   : > { %978 = vst [vmem:[%s2461_s24 + $0x8] sm:$0xff] %v896_v57  ;;  %v1006_v0 = vmul.f32 %v896_v57, %v896_v57  ;;  %v987_v2 = vrot.slane %v896_v57, 4 }
  0xd4   : > { %v921_v59 = vpop.f32.mrf.mxu3 }
  0xd5   : > { %v884_v60 = vpop.f32.mrf.mxu0  ;;  %v1015_v4 = vrot.slane %v1006_v0, 4  ;;  %v988_v9 = vadd.f32 %v987_v2, %v896_v57  ;;  %v985_v57 = vrot.slane %v984_v50, 1 }
  0xd7   : > { %v908_v58 = vpop.f32.mrf.mxu2  ;;  %v1016_v12 = vadd.f32 %v1015_v4, %v1006_v0  ;;  %v989_v18 = vrot.slane %v988_v9, 2 }
  0xd8   : > { %v897_v61 = vpop.f32.mrf.mxu1  ;;  %v922_v3 = vadd.f32 %v921_v59, %v908_v58  ;;  %v1014_v58 = vadd.f32 %v1013_v51, %v1012_v38 }
  0xd9   : > { %v1017_v21 = vrot.slane %v1016_v12, 2  ;;  %v990_v32 = vadd.f32 %v989_v18, %v988_v9 }
  0xda   : > { %v1044_v4 = vrot.slane %v1014_v58, 4 }
  0xdb   : > { %v1018_v33 = vadd.f32 %v1017_v21, %v1016_v12  ;;  %v991_v43 = vrot.slane %v990_v32, 1 }
  0xdc   : > { %v923_v63 = vpop.f32.mrf.mxu3 }
  0xdd   : > { %v1019_v45 = vrot.slane %v1018_v33, 1  ;;  %v992_v42 = vadd.f32 %v991_v43, %v990_v32 }
  0xdf   : > { %v910_v62 = vpop.f32.mrf.mxu2  ;;  %v1020_v54 = vadd.f32 %v1019_v45, %v1018_v33 }
  0xe0   : > { %v1041_v62 = vrot.slane %v992_v42, 7 }
  0xe1   : > { %v1045_v63 = vrot.slane %v1020_v54, 3 }
  0xe3   : > { %v1055_v9 = vsel %vm1054_vm1, %v1044_v4, %v1045_v63 }
  0xed   : > { %v934_v5 = vpop.f32.mrf.mxu0 }
  0xee   : > { %v935_v7 = vadd.f32 %v934_v5, %v922_v3  ;;  %v947_v8 = vpop.f32.mrf.mxu1  ;;  %v986_v3 = vadd.f32 %v985_v57, %v984_v50 }
  0xf0   : > { %979 = vst [vmem:[%s2461_s24 + $0x10] sm:$0xff] %v935_v7  ;;  %v993_v10 = vrot.slane %v935_v7, 4  ;;  %v1007_v11 = vmul.f32 %v935_v7, %v935_v7 }
  0xf2   : > { %v994_v16 = vadd.f32 %v993_v10, %v935_v7  ;;  %v1021_v17 = vrot.slane %v1007_v11, 4 }
  0xf4   : > { %v1022_v19 = vadd.f32 %v1021_v17, %v1007_v11  ;;  %v995_v22 = vrot.slane %v994_v16, 2  ;;  %v973_v24 = vpop.f32.mrf.mxu3 }
  0xf5   : > { %v960_v20 = vpop.f32.mrf.mxu2  ;;  %v936_v25 = vpop.f32.mrf.mxu0 }
  0xf6   : > { %v961_v23 = vadd.f32 %v960_v20, %v947_v8  ;;  %v949_v28 = vpop.f32.mrf.mxu1  ;;  %v1023_v29 = vrot.slane %v1022_v19, 2  ;;  %v996_v34 = vadd.f32 %v995_v22, %v994_v16  ;;  %v1049_v8 = vsel %vm1048_vm0, %v986_v3, %v1041_v62 }
  0xf8   : > { %v974_v31 = vadd.f32 %v973_v24, %v961_v23  ;;  %v1024_v39 = vadd.f32 %v1023_v29, %v1022_v19  ;;  %v997_v46 = vrot.slane %v996_v34, 1 }
  0xfa   : > { %980 = vst [vmem:[%s2461_s24 + $0x18] sm:$0xff] %v974_v31  ;;  %v999_v35 = vrot.slane %v974_v31, 4  ;;  %v1008_v36 = vmul.f32 %v974_v31, %v974_v31  ;;  %v1025_v52 = vrot.slane %v1024_v39, 1  ;;  %v998_v30 = vadd.f32 %v997_v46, %v996_v34 }
  0xfc   : > { %v1000_v40 = vadd.f32 %v999_v35, %v974_v31  ;;  %v1027_v41 = vrot.slane %v1008_v36, 4  ;;  %v975_v49 = vpop.f32.mrf.mxu3  ;;  %v1026_v59 = vadd.f32 %v1025_v52, %v1024_v39  ;;  %v1042_v0 = vrot.slane %v998_v30, 6 }
  0xfd   : > { %v962_v44 = vpop.f32.mrf.mxu2 }
  0xfe   : > { %v1001_v47 = vrot.slane %v1000_v40, 2  ;;  %v1028_v48 = vadd.f32 %v1027_v41, %v1008_v36  ;;  %v1046_v5 = vrot.slane %v1026_v59, 2 }
 0x100   : > { %v1002_v53 = vadd.f32 %v1001_v47, %v1000_v40  ;;  %v1029_v14 = vrot.slane %v1028_v48, 2 }
 0x102   : > { %v1003_v55 = vrot.slane %v1002_v53, 1  ;;  %v1030_v56 = vadd.f32 %v1029_v14, %v1028_v48 }
 0x104   : > { %v1004_v60 = vadd.f32 %v1003_v55, %v1002_v53  ;;  %v1031_v61 = vrot.slane %v1030_v56, 1 }
 0x106   : > { %v1032_v1 = vadd.f32 %v1031_v61, %v1030_v56  ;;  %v1043_v2 = vrot.slane %v1004_v60, 5 }
 0x108   : > { %v1047_v6 = vrot.slane %v1032_v1, 1  ;;  %v1051_v7 = vsel %vm1050_vm2, %v1042_v0, %v1043_v2 }
 0x109   : > { %v1053_v11 = vsel %vm1052_vm3, %v1049_v8, %v1051_v7 }
 0x10a   : > { %v1057_v10 = vsel %vm1056_vm4, %v1046_v5, %v1047_v6 }
 0x10b   : > { %v1059_v12 = vsel %vm1058_vm5, %v1055_v9, %v1057_v10 }
 0x10c   : > { %v1061_v13 = vsel %vm1060_vm6, %v1053_v11, %v1059_v12 }
 0x10d   : > { %1063 = vst [vmem:[%s227_s26] sm:$0xff] %v1061_v13 }
 0x10e PF: > { %s14_s16 = sadd.s32 1, %s1784_s16   ;;  %s2492_s12 = smov %s1776_s14 }
 0x10f   : > { %p11_p7 = scmp.ge.s32.totalorder %s14_s16, 6   ;;  %s2493_s13 = smov %s1780_s15 }
 0x110   : > { %s2494_s14 = smov %s2497_s17  ;;  %s2495_s15 = smov %s2501_s18 }
 0x111   :  { %13 = sbr.rel (!%p11_p7) target bundleno = 3 (0x3), region = 70 }

// kernel: building_block.3
= control target key start
LH: loop header
LB: loop body
LE: loop exit
PB: predicated region body
PF: predicated region fallthrough
CT: control target
= control target key end

     0   :  { %s463_s12 = smov 0   ;;  %s465_s13 = smov 0   ;;  %s520_s0 = inlined_call_operand.vmem [shape: f32[2,2,8,512], index: 0, kind: input, shape index: {}]   ;;  %s521_s1 = inlined_call_operand.vmem [shape: f32[1,512], index: 1, kind: input, shape index: {}]   ;;  %s522_s2 = inlined_call_operand.vmem [shape: f32[1,512], index: 2, kind: input, shape index: {}]   ;;  %s523_s3 = inlined_call_operand.vmem [shape: f32[2,2,8,512], index: 3, kind: output, shape index: {}]  }
   0x1   :  { %s467_s14 = smov 0   ;;  %s469_s15 = smov 0  }
   0x2   :  { %s471_s16 = smov 0  }
   0x3 LB: > { %s22_s17 = sadd.s32 1, %s433_s14  ;;  %s25_s18 = sadd.s32 1, %s437_s15  ;;  %s441_s16 = sphi %s471_s16, %s13_s16   ;;  %s437_s15 = sphi %s469_s15, %s527_s15   ;;  %s433_s14 = sphi %s467_s14, %s526_s14   ;;  %s429_s13 = sphi %s465_s13, %s525_s13   ;;  %s425_s12 = sphi %s463_s12, %s524_s12  }
   0x4   : > { %p23_p0 = scmp.ge.s32.totalorder %s22_s17, 2  ;;  %p354_p1 = scmp.ge.s32.totalorder %s441_s16, 1 }
   0x5   : > { %p157_p2 = scmp.lt.s32.totalorder %s441_s16, 5 }
   0x6   : > { %s529_s17 = smov (%p23_p0, %s22_s17), 0  ;;  %s531_s18 = smov (!%p23_p0, %s25_s18), %s437_s15 }
   0x7   : > { %p158_p3 = pnand %p354_p1, %p157_p2  ;;  %p27_p4 = scmp.ge.s32.totalorder %s531_s18, 2 }
   0x8   : > { %p189_p5 = scmp.lt.s32.totalorder (!%p158_p3), %s429_s13, 1  ;;  %p191_p6 = scmp.lt.s32.totalorder (!%p158_p3), %s425_s12, 1 }
   0x9   : > { %s533_s18 = smov (%p27_p4, %s531_s18), 0  ;;  %161 = sbr.rel (%p158_p3) target bundleno = 31 (0x1f), region = 32 }
   0xe   : > { %s535_s13 = smov (!%p189_p5, %s429_s13), 1  ;;  %s537_s12 = smov (!%p191_p6, %s425_s12), 1  ;;  %v211_v0 = vld [vmem:[%s521_s1] sm:$0xf] }
   0xf   : > { %s356_s21 = sshll.u32 %s535_s13, 3  ;;  %s355_s22 = sshll.u32 %s537_s12, 2  ;;  %v225_v1 = vld [vmem:[%s522_s2] sm:$0xf]  ;;  %v213_v2 = vperm.slane %v211_v0, 0  ;;  %v214_v3 = vperm.slane %v211_v0, 1 }
  0x10   : > { %s195_s25 = sadd.s32 %s356_s21, %s355_s22  ;;  %v215_v4 = vperm.slane %v211_v0, 2  ;;  %v216_v5 = vperm.slane %v211_v0, 3  ;;  %v227_v6 = vperm.slane %v225_v1, 0  ;;  %v228_v7 = vperm.slane %v225_v1, 1 }
  0x11   : > { %s357_s26 = sshll.u32 %s195_s25, 3  ;;  %v229_v8 = vperm.slane %v225_v1, 2  ;;  %v230_v12 = vperm.slane %v225_v1, 3 }
  0x12   : > { %s197_s29 = scalar_lea.vmem %s520_s0, %s357_s26  ;;  %s206_s5 = scalar_lea.vmem %s523_s3, %s357_s26 }
  0x13   : > { %v207_v9 = vld [vmem:[%s197_s29] sm:$0xff]  ;;  %v208_v10 = vld [vmem:[%s197_s29 + $0x8] sm:$0xff]  ;;  %v209_v11 = vld [vmem:[%s197_s29 + $0x10] sm:$0xff] }
  0x14   : > { %v221_v13 = vmul.f32 %v213_v2, %v207_v9  ;;  %v222_v14 = vmul.f32 %v214_v3, %v208_v10  ;;  %v223_v15 = vmul.f32 %v215_v4, %v209_v11  ;;  %v210_v16 = vld [vmem:[%s197_s29 + $0x18] sm:$0xff] }
  0x15   : > { %v224_v17 = vmul.f32 %v216_v5, %v210_v16 }
  0x16   : > { %v235_v18 = vadd.f32 %v227_v6, %v221_v13  ;;  %v236_v19 = vadd.f32 %v228_v7, %v222_v14  ;;  %v237_v20 = vadd.f32 %v229_v8, %v223_v15 }
  0x17   : > { %v238_v21 = vadd.f32 %v230_v12, %v224_v17 }
  0x18   : > { %vm239_vm0 = vcmp.gt.f32.partialorder %v235_v18, 0.0  ;;  %v243_v22 = vmul.f32 0.01, %v235_v18  ;;  %vm240_vm1 = vcmp.gt.f32.partialorder %v236_v19, 0.0  ;;  %v244_v23 = vmul.f32 0.01, %v236_v19 }
  0x19   : > { %vm241_vm2 = vcmp.gt.f32.partialorder %v237_v20, 0.0  ;;  %v245_v24 = vmul.f32 0.01, %v237_v20  ;;  %vm242_vm3 = vcmp.gt.f32.partialorder %v238_v21, 0.0  ;;  %v246_v25 = vmul.f32 0.01, %v238_v21 }
  0x1a   : > { %v247_v26 = vsel %vm239_vm0, %v235_v18, %v243_v22  ;;  %v248_v27 = vsel %vm240_vm1, %v236_v19, %v244_v23 }
  0x1b   : > { %251 = vst [vmem:[%s206_s5] sm:$0xff] %v247_v26  ;;  %v249_v28 = vsel %vm241_vm2, %v237_v20, %v245_v24  ;;  %v250_v29 = vsel %vm242_vm3, %v238_v21, %v246_v25 }
  0x1c   : > { %252 = vst [vmem:[%s206_s5 + $0x8] sm:$0xff] %v248_v27 }
  0x1d   : > { %253 = vst [vmem:[%s206_s5 + $0x10] sm:$0xff] %v249_v28 }
  0x1e   : > { %254 = vst [vmem:[%s206_s5 + $0x18] sm:$0xff] %v250_v29 }
  0x1f PF: > { %s13_s16 = sadd.s32 1, %s441_s16   ;;  %s524_s12 = smov %s433_s14 }
  0x20   : > { %p10_p7 = scmp.ge.s32.totalorder %s13_s16, 6   ;;  %s525_s13 = smov %s437_s15 }
  0x21   : > { %s526_s14 = smov %s529_s17  ;;  %s527_s15 = smov %s533_s18 }
  0x22   :  { %12 = sbr.rel (!%p10_p7) target bundleno = 3 (0x3), region = 62 }

</bundles_post_ra>
